<compile_context>
chip_gen: v6e
topology: v6e:2x2x1
jax: 0.10.0
libtpu: 0.0.40
codegen_flags: <defaults>
</compile_context>

<pallas_src>
import functools

import jax
import jax.numpy as jnp
from jax.experimental import pallas as pl
from jax.experimental.pallas import tpu as pltpu

INPUT_SIZE = 1
HIDDEN_SIZE = 16
BATCH = 2
SEQ = 8
LANES = 128  # all four gates packed into a single 128-lane block


def lstm_forecast_kernel(x_ref, p_ref, out_ref, *, hidden_size):
    # x_ref:   (S, B, 1)   time-major inputs (input_size == 1)
    # p_ref:   (24, 128)   packed params:
    #            rows 0:H   -> weight_hh_l0.T  (H, 4H) zero-padded to 128 lanes
    #            row  H     -> weight_ih_l0.T  (1, 4H) zero-padded
    #            row  H+1   -> bias_ih + bias_hh (1, 4H) zero-padded
    #            row  H+2   -> linear.weight   (1, H)  zero-padded
    #            row  H+3   -> linear.bias     (1, 1)  zero-padded
    # out_ref: (B, 1)
    H = hidden_size
    S = x_ref.shape[0]
    B = x_ref.shape[1]
    L = p_ref.shape[1]

    w_hh = p_ref[0:H, :]                      # (H, L)  small MXU RHS, loop-invariant
    w_ih = p_ref[H:H + 1, :]                  # (1, L)
    bias = p_ref[H + 1:H + 2, :]              # (1, L)
    w_lin = p_ref[H + 2:H + 3, :][:, 0:H]     # (1, H)
    b_lin = p_ref[H + 3:H + 4, :][:, 0:1]     # (1, 1)

    h = jnp.zeros((B, H), jnp.float32)
    c = jnp.zeros((B, H), jnp.float32)

    # Fully-unrolled serial recurrence. Per step: 1 MXU push ((B,H)@(H,128)), 3 EUP pushes,
    # 3 XLU rolls, and a handful of VPU ops that co-issue under the MXU/EUP latency.
    for t in range(S):
        x_t = x_ref[t]                                                     # (B, 1)
        gates = x_t * w_ih + bias + jnp.dot(
            h, w_hh, preferred_element_type=jnp.float32)                   # (B, L); lanes >= 4H are 0
        # sigmoid(x) = 0.5 * tanh(0.5 * x) + 0.5  (single EUP tanh, no exp+divide)
        sig = 0.5 * jnp.tanh(0.5 * gates) + 0.5                            # i, f, o
        tnh = jnp.tanh(gates)                                              # g
        i_g = sig[:, 0:H]                                                  # lanes 0:H
        f_g = pltpu.roll(sig, shift=L - H, axis=1)[:, 0:H]                 # lanes H:2H   -> 0:H
        g_g = pltpu.roll(tnh, shift=L - 2 * H, axis=1)[:, 0:H]             # lanes 2H:3H  -> 0:H
        o_g = pltpu.roll(sig, shift=L - 3 * H, axis=1)[:, 0:H]             # lanes 3H:4H  -> 0:H
        c = f_g * c + i_g * g_g
        h = o_g * jnp.tanh(c)

    # Linear(H -> 1): VPU multiply + lane reduction (avoids a degenerate 1-lane-wide MXU matmul).
    out = jnp.sum(h * w_lin, axis=-1, keepdims=True) + b_lin               # (B, 1)
    out_ref[...] = out.astype(out_ref.dtype)


def _pack_params(w_ih, w_hh, b_ih, b_hh, w_lin, b_lin, hidden_size, lanes=LANES):
    """Pack all LSTM + Linear params (PyTorch layout, native [i,f,g,o] gate order) into (24, lanes)."""
    H = hidden_size
    f32 = jnp.float32
    pad_lanes = lambda a: jnp.pad(a.astype(f32), ((0, 0), (0, lanes - a.shape[1])))
    rows = [
        pad_lanes(w_hh.T),                        # rows 0:H   (H, 4H) -> (H, lanes)
        pad_lanes(w_ih.T),                        # row  H     (1, 4H) -> (1, lanes)
        pad_lanes((b_ih + b_hh).reshape(1, -1)),  # row  H+1
        pad_lanes(w_lin),                         # row  H+2   (1, H)  -> (1, lanes)
        pad_lanes(b_lin.reshape(1, 1)),           # row  H+3   (1, 1)  -> (1, lanes)
    ]
    p = jnp.concatenate(rows, axis=0)             # (H+4, lanes)
    pad_rows = (-p.shape[0]) % 8                  # sublane-align the block
    return jnp.pad(p, ((0, pad_rows), (0, 0)))


def lstm_forecast(x, w_ih, w_hh, b_ih, b_hh, w_lin, b_lin):
    """x: (B, S, 1); weights/biases in PyTorch nn.LSTM / nn.Linear layout."""
    B, S, I = x.shape
    assert I == 1, "kernel packing assumes input_size == 1"
    H = w_hh.shape[1]
    assert 4 * H <= LANES, "all four gates must fit in one 128-lane block"

    x_tm = jnp.transpose(x, (1, 0, 2)).astype(jnp.float32)                 # (S, B, 1) time-major
    params = _pack_params(w_ih, w_hh, b_ih, b_hh, w_lin, b_lin, H)          # (24, 128)

    vmem = pl.BlockSpec(memory_space=pltpu.MemorySpace.VMEM)
    kernel = functools.partial(lstm_forecast_kernel, hidden_size=H)
    return pl.pallas_call(
        kernel,
        out_shape=jax.ShapeDtypeStruct((B, 1), jnp.float32),
        in_specs=[vmem, vmem],
        out_specs=vmem,
    )(x_tm, params)


def lstm_forecast_ref(x, w_ih, w_hh, b_ih, b_hh, w_lin, b_lin):
    """Pure-JAX reference with PyTorch nn.LSTM(batch_first=True) + nn.Linear semantics."""
    B, S, I = x.shape
    H = w_hh.shape[1]
    w_ih_t = w_ih.T
    w_hh_t = w_hh.T
    b = b_ih + b_hh
    h = jnp.zeros((B, H), jnp.float32)
    c = jnp.zeros((B, H), jnp.float32)
    for t in range(S):
        gates = x[:, t, :] @ w_ih_t + h @ w_hh_t + b
        i_g = jax.nn.sigmoid(gates[:, 0 * H:1 * H])
        f_g = jax.nn.sigmoid(gates[:, 1 * H:2 * H])
        g_g = jnp.tanh(gates[:, 2 * H:3 * H])
        o_g = jax.nn.sigmoid(gates[:, 3 * H:4 * H])
        c = f_g * c + i_g * g_g
        h = o_g * jnp.tanh(c)
    return h @ w_lin.T + b_lin


if __name__ == "__main__":
    key = jax.random.PRNGKey(0)
    k_x, k_wih, k_whh, k_bih, k_bhh, k_wl, k_bl = jax.random.split(key, 7)

    # PyTorch-style uniform(-1/sqrt(H), 1/sqrt(H)) init, PyTorch parameter shapes.
    bound = 1.0 / jnp.sqrt(jnp.float32(HIDDEN_SIZE))
    w_ih = jax.random.uniform(k_wih, (4 * HIDDEN_SIZE, INPUT_SIZE), jnp.float32, -bound, bound)
    w_hh = jax.random.uniform(k_whh, (4 * HIDDEN_SIZE, HIDDEN_SIZE), jnp.float32, -bound, bound)
    b_ih = jax.random.uniform(k_bih, (4 * HIDDEN_SIZE,), jnp.float32, -bound, bound)
    b_hh = jax.random.uniform(k_bhh, (4 * HIDDEN_SIZE,), jnp.float32, -bound, bound)
    w_lin = jax.random.uniform(k_wl, (1, HIDDEN_SIZE), jnp.float32, -bound, bound)
    b_lin = jax.random.uniform(k_bl, (1,), jnp.float32, -bound, bound)

    # Example input: (batch, seq, input_size) — the PyTorch module's batch_first layout.
    x = jax.random.normal(k_x, (BATCH, SEQ, INPUT_SIZE), jnp.float32)

    out = lstm_forecast(x, w_ih, w_hh, b_ih, b_hh, w_lin, b_lin)
    out = jax.block_until_ready(out)

    ref = lstm_forecast_ref(x, w_ih, w_hh, b_ih, b_hh, w_lin, b_lin)
    assert out.shape == (BATCH, 1)
    assert jnp.allclose(out, ref, atol=2e-5, rtol=1e-4), (out, ref)
    print("KERNEL_OK")
</pallas_src>

<mosaic_0001>
module attributes {stable_mosaic.version = 11 : i64} {
  func.func @lstm_forecast_kernel(%arg0: memref<8x2x1xf32, #tpu.memory_space<vmem>>, %arg1: memref<24x128xf32, #tpu.memory_space<vmem>>, %arg2: memref<2x1xf32, #tpu.memory_space<vmem>>) attributes {dimension_semantics = [], scalar_prefetch = 0 : i64, scratch_operands = 0 : i64, tpu.core_type = #tpu.core_type<tc>} {
    %c0 = arith.constant 0 : index
    %c0_0 = arith.constant 0 : index
    %0 = vector.load %arg1[%c0, %c0_0] : memref<24x128xf32, #tpu.memory_space<vmem>>, vector<16x128xf32>
    %c16 = arith.constant 16 : index
    %c0_1 = arith.constant 0 : index
    %1 = vector.load %arg1[%c16, %c0_1] : memref<24x128xf32, #tpu.memory_space<vmem>>, vector<1x128xf32>
    %c17 = arith.constant 17 : index
    %c0_2 = arith.constant 0 : index
    %2 = vector.load %arg1[%c17, %c0_2] : memref<24x128xf32, #tpu.memory_space<vmem>>, vector<1x128xf32>
    %c18 = arith.constant 18 : index
    %c0_3 = arith.constant 0 : index
    %3 = vector.load %arg1[%c18, %c0_3] : memref<24x128xf32, #tpu.memory_space<vmem>>, vector<1x128xf32>
    %4 = vector.extract_strided_slice %3 {offsets = [0, 0], sizes = [1, 16], strides = [1, 1]} : vector<1x128xf32> to vector<1x16xf32>
    %c19 = arith.constant 19 : index
    %c0_4 = arith.constant 0 : index
    %5 = vector.load %arg1[%c19, %c0_4] : memref<24x128xf32, #tpu.memory_space<vmem>>, vector<1x128xf32>
    %6 = vector.extract_strided_slice %5 {offsets = [0, 0], sizes = [1, 1], strides = [1, 1]} : vector<1x128xf32> to vector<1x1xf32>
    %cst = arith.constant 0.000000e+00 : f32
    %7 = vector.broadcast %cst : f32 to vector<2x16xf32>
    %cst_5 = arith.constant 0.000000e+00 : f32
    %8 = vector.broadcast %cst_5 : f32 to vector<2x16xf32>
    %c0_6 = arith.constant 0 : index
    %c0_7 = arith.constant 0 : index
    %c0_8 = arith.constant 0 : index
    %9 = vector.load %arg0[%c0_6, %c0_7, %c0_8] : memref<8x2x1xf32, #tpu.memory_space<vmem>>, vector<1x2x1xf32>
    %10 = vector.shape_cast %9 : vector<1x2x1xf32> to vector<2x1xf32>
    %11 = vector.broadcast %10 : vector<2x1xf32> to vector<2x128xf32>
    %12 = vector.broadcast %1 : vector<1x128xf32> to vector<2x128xf32>
    %13 = arith.mulf %11, %12 : vector<2x128xf32>
    %14 = vector.broadcast %2 : vector<1x128xf32> to vector<2x128xf32>
    %15 = arith.addf %13, %14 : vector<2x128xf32>
    %cst_9 = arith.constant dense<0.000000e+00> : vector<2x128xf32>
    %16 = tpu.matmul %7, %0, %cst_9 {dimension_numbers = #tpu.dot_dimension_numbers<[1], [0], [0], [1], [0, 0, 1, 1], [], []>} : vector<2x16xf32>, vector<16x128xf32>, vector<2x128xf32> -> vector<2x128xf32>
    %17 = arith.addf %15, %16 : vector<2x128xf32>
    %cst_10 = arith.constant 5.000000e-01 : f32
    %18 = vector.broadcast %cst_10 : f32 to vector<2x128xf32>
    %19 = arith.mulf %18, %17 : vector<2x128xf32>
    %20 = math.tanh %19 : vector<2x128xf32>
    %cst_11 = arith.constant 5.000000e-01 : f32
    %21 = vector.broadcast %cst_11 : f32 to vector<2x128xf32>
    %22 = arith.mulf %21, %20 : vector<2x128xf32>
    %cst_12 = arith.constant 5.000000e-01 : f32
    %23 = vector.broadcast %cst_12 : f32 to vector<2x128xf32>
    %24 = arith.addf %22, %23 : vector<2x128xf32>
    %25 = math.tanh %17 : vector<2x128xf32>
    %26 = vector.extract_strided_slice %24 {offsets = [0, 0], sizes = [2, 16], strides = [1, 1]} : vector<2x128xf32> to vector<2x16xf32>
    %c112_i32 = arith.constant 112 : i32
    %27 = tpu.dynamic_rotate %24 by %c112_i32 dim 1 : vector<2x128xf32>, i32 -> vector<2x128xf32>
    %28 = vector.extract_strided_slice %27 {offsets = [0, 0], sizes = [2, 16], strides = [1, 1]} : vector<2x128xf32> to vector<2x16xf32>
    %c96_i32 = arith.constant 96 : i32
    %29 = tpu.dynamic_rotate %25 by %c96_i32 dim 1 : vector<2x128xf32>, i32 -> vector<2x128xf32>
    %30 = vector.extract_strided_slice %29 {offsets = [0, 0], sizes = [2, 16], strides = [1, 1]} : vector<2x128xf32> to vector<2x16xf32>
    %c80_i32 = arith.constant 80 : i32
    %31 = tpu.dynamic_rotate %24 by %c80_i32 dim 1 : vector<2x128xf32>, i32 -> vector<2x128xf32>
    %32 = vector.extract_strided_slice %31 {offsets = [0, 0], sizes = [2, 16], strides = [1, 1]} : vector<2x128xf32> to vector<2x16xf32>
    %33 = arith.mulf %28, %8 : vector<2x16xf32>
    %34 = arith.mulf %26, %30 : vector<2x16xf32>
    %35 = arith.addf %33, %34 : vector<2x16xf32>
    %36 = math.tanh %35 : vector<2x16xf32>
    %37 = arith.mulf %32, %36 : vector<2x16xf32>
    %c1 = arith.constant 1 : index
    %c0_13 = arith.constant 0 : index
    %c0_14 = arith.constant 0 : index
    %38 = vector.load %arg0[%c1, %c0_13, %c0_14] : memref<8x2x1xf32, #tpu.memory_space<vmem>>, vector<1x2x1xf32>
    %39 = vector.shape_cast %38 : vector<1x2x1xf32> to vector<2x1xf32>
    %40 = vector.broadcast %39 : vector<2x1xf32> to vector<2x128xf32>
    %41 = vector.broadcast %1 : vector<1x128xf32> to vector<2x128xf32>
    %42 = arith.mulf %40, %41 : vector<2x128xf32>
    %43 = vector.broadcast %2 : vector<1x128xf32> to vector<2x128xf32>
    %44 = arith.addf %42, %43 : vector<2x128xf32>
    %cst_15 = arith.constant dense<0.000000e+00> : vector<2x128xf32>
    %45 = tpu.matmul %37, %0, %cst_15 {dimension_numbers = #tpu.dot_dimension_numbers<[1], [0], [0], [1], [0, 0, 1, 1], [], []>} : vector<2x16xf32>, vector<16x128xf32>, vector<2x128xf32> -> vector<2x128xf32>
    %46 = arith.addf %44, %45 : vector<2x128xf32>
    %cst_16 = arith.constant 5.000000e-01 : f32
    %47 = vector.broadcast %cst_16 : f32 to vector<2x128xf32>
    %48 = arith.mulf %47, %46 : vector<2x128xf32>
    %49 = math.tanh %48 : vector<2x128xf32>
    %cst_17 = arith.constant 5.000000e-01 : f32
    %50 = vector.broadcast %cst_17 : f32 to vector<2x128xf32>
    %51 = arith.mulf %50, %49 : vector<2x128xf32>
    %cst_18 = arith.constant 5.000000e-01 : f32
    %52 = vector.broadcast %cst_18 : f32 to vector<2x128xf32>
    %53 = arith.addf %51, %52 : vector<2x128xf32>
    %54 = math.tanh %46 : vector<2x128xf32>
    %55 = vector.extract_strided_slice %53 {offsets = [0, 0], sizes = [2, 16], strides = [1, 1]} : vector<2x128xf32> to vector<2x16xf32>
    %c112_i32_19 = arith.constant 112 : i32
    %56 = tpu.dynamic_rotate %53 by %c112_i32_19 dim 1 : vector<2x128xf32>, i32 -> vector<2x128xf32>
    %57 = vector.extract_strided_slice %56 {offsets = [0, 0], sizes = [2, 16], strides = [1, 1]} : vector<2x128xf32> to vector<2x16xf32>
    %c96_i32_20 = arith.constant 96 : i32
    %58 = tpu.dynamic_rotate %54 by %c96_i32_20 dim 1 : vector<2x128xf32>, i32 -> vector<2x128xf32>
    %59 = vector.extract_strided_slice %58 {offsets = [0, 0], sizes = [2, 16], strides = [1, 1]} : vector<2x128xf32> to vector<2x16xf32>
    %c80_i32_21 = arith.constant 80 : i32
    %60 = tpu.dynamic_rotate %53 by %c80_i32_21 dim 1 : vector<2x128xf32>, i32 -> vector<2x128xf32>
    %61 = vector.extract_strided_slice %60 {offsets = [0, 0], sizes = [2, 16], strides = [1, 1]} : vector<2x128xf32> to vector<2x16xf32>
    %62 = arith.mulf %57, %35 : vector<2x16xf32>
    %63 = arith.mulf %55, %59 : vector<2x16xf32>
    %64 = arith.addf %62, %63 : vector<2x16xf32>
    %65 = math.tanh %64 : vector<2x16xf32>
    %66 = arith.mulf %61, %65 : vector<2x16xf32>
    %c2 = arith.constant 2 : index
    %c0_22 = arith.constant 0 : index
    %c0_23 = arith.constant 0 : index
    %67 = vector.load %arg0[%c2, %c0_22, %c0_23] : memref<8x2x1xf32, #tpu.memory_space<vmem>>, vector<1x2x1xf32>
    %68 = vector.shape_cast %67 : vector<1x2x1xf32> to vector<2x1xf32>
    %69 = vector.broadcast %68 : vector<2x1xf32> to vector<2x128xf32>
    %70 = vector.broadcast %1 : vector<1x128xf32> to vector<2x128xf32>
    %71 = arith.mulf %69, %70 : vector<2x128xf32>
    %72 = vector.broadcast %2 : vector<1x128xf32> to vector<2x128xf32>
    %73 = arith.addf %71, %72 : vector<2x128xf32>
    %cst_24 = arith.constant dense<0.000000e+00> : vector<2x128xf32>
    %74 = tpu.matmul %66, %0, %cst_24 {dimension_numbers = #tpu.dot_dimension_numbers<[1], [0], [0], [1], [0, 0, 1, 1], [], []>} : vector<2x16xf32>, vector<16x128xf32>, vector<2x128xf32> -> vector<2x128xf32>
    %75 = arith.addf %73, %74 : vector<2x128xf32>
    %cst_25 = arith.constant 5.000000e-01 : f32
    %76 = vector.broadcast %cst_25 : f32 to vector<2x128xf32>
    %77 = arith.mulf %76, %75 : vector<2x128xf32>
    %78 = math.tanh %77 : vector<2x128xf32>
    %cst_26 = arith.constant 5.000000e-01 : f32
    %79 = vector.broadcast %cst_26 : f32 to vector<2x128xf32>
    %80 = arith.mulf %79, %78 : vector<2x128xf32>
    %cst_27 = arith.constant 5.000000e-01 : f32
    %81 = vector.broadcast %cst_27 : f32 to vector<2x128xf32>
    %82 = arith.addf %80, %81 : vector<2x128xf32>
    %83 = math.tanh %75 : vector<2x128xf32>
    %84 = vector.extract_strided_slice %82 {offsets = [0, 0], sizes = [2, 16], strides = [1, 1]} : vector<2x128xf32> to vector<2x16xf32>
    %c112_i32_28 = arith.constant 112 : i32
    %85 = tpu.dynamic_rotate %82 by %c112_i32_28 dim 1 : vector<2x128xf32>, i32 -> vector<2x128xf32>
    %86 = vector.extract_strided_slice %85 {offsets = [0, 0], sizes = [2, 16], strides = [1, 1]} : vector<2x128xf32> to vector<2x16xf32>
    %c96_i32_29 = arith.constant 96 : i32
    %87 = tpu.dynamic_rotate %83 by %c96_i32_29 dim 1 : vector<2x128xf32>, i32 -> vector<2x128xf32>
    %88 = vector.extract_strided_slice %87 {offsets = [0, 0], sizes = [2, 16], strides = [1, 1]} : vector<2x128xf32> to vector<2x16xf32>
    %c80_i32_30 = arith.constant 80 : i32
    %89 = tpu.dynamic_rotate %82 by %c80_i32_30 dim 1 : vector<2x128xf32>, i32 -> vector<2x128xf32>
    %90 = vector.extract_strided_slice %89 {offsets = [0, 0], sizes = [2, 16], strides = [1, 1]} : vector<2x128xf32> to vector<2x16xf32>
    %91 = arith.mulf %86, %64 : vector<2x16xf32>
    %92 = arith.mulf %84, %88 : vector<2x16xf32>
    %93 = arith.addf %91, %92 : vector<2x16xf32>
    %94 = math.tanh %93 : vector<2x16xf32>
    %95 = arith.mulf %90, %94 : vector<2x16xf32>
    %c3 = arith.constant 3 : index
    %c0_31 = arith.constant 0 : index
    %c0_32 = arith.constant 0 : index
    %96 = vector.load %arg0[%c3, %c0_31, %c0_32] : memref<8x2x1xf32, #tpu.memory_space<vmem>>, vector<1x2x1xf32>
    %97 = vector.shape_cast %96 : vector<1x2x1xf32> to vector<2x1xf32>
    %98 = vector.broadcast %97 : vector<2x1xf32> to vector<2x128xf32>
    %99 = vector.broadcast %1 : vector<1x128xf32> to vector<2x128xf32>
    %100 = arith.mulf %98, %99 : vector<2x128xf32>
    %101 = vector.broadcast %2 : vector<1x128xf32> to vector<2x128xf32>
    %102 = arith.addf %100, %101 : vector<2x128xf32>
    %cst_33 = arith.constant dense<0.000000e+00> : vector<2x128xf32>
    %103 = tpu.matmul %95, %0, %cst_33 {dimension_numbers = #tpu.dot_dimension_numbers<[1], [0], [0], [1], [0, 0, 1, 1], [], []>} : vector<2x16xf32>, vector<16x128xf32>, vector<2x128xf32> -> vector<2x128xf32>
    %104 = arith.addf %102, %103 : vector<2x128xf32>
    %cst_34 = arith.constant 5.000000e-01 : f32
    %105 = vector.broadcast %cst_34 : f32 to vector<2x128xf32>
    %106 = arith.mulf %105, %104 : vector<2x128xf32>
    %107 = math.tanh %106 : vector<2x128xf32>
    %cst_35 = arith.constant 5.000000e-01 : f32
    %108 = vector.broadcast %cst_35 : f32 to vector<2x128xf32>
    %109 = arith.mulf %108, %107 : vector<2x128xf32>
    %cst_36 = arith.constant 5.000000e-01 : f32
    %110 = vector.broadcast %cst_36 : f32 to vector<2x128xf32>
    %111 = arith.addf %109, %110 : vector<2x128xf32>
    %112 = math.tanh %104 : vector<2x128xf32>
    %113 = vector.extract_strided_slice %111 {offsets = [0, 0], sizes = [2, 16], strides = [1, 1]} : vector<2x128xf32> to vector<2x16xf32>
    %c112_i32_37 = arith.constant 112 : i32
    %114 = tpu.dynamic_rotate %111 by %c112_i32_37 dim 1 : vector<2x128xf32>, i32 -> vector<2x128xf32>
    %115 = vector.extract_strided_slice %114 {offsets = [0, 0], sizes = [2, 16], strides = [1, 1]} : vector<2x128xf32> to vector<2x16xf32>
    %c96_i32_38 = arith.constant 96 : i32
    %116 = tpu.dynamic_rotate %112 by %c96_i32_38 dim 1 : vector<2x128xf32>, i32 -> vector<2x128xf32>
    %117 = vector.extract_strided_slice %116 {offsets = [0, 0], sizes = [2, 16], strides = [1, 1]} : vector<2x128xf32> to vector<2x16xf32>
    %c80_i32_39 = arith.constant 80 : i32
    %118 = tpu.dynamic_rotate %111 by %c80_i32_39 dim 1 : vector<2x128xf32>, i32 -> vector<2x128xf32>
    %119 = vector.extract_strided_slice %118 {offsets = [0, 0], sizes = [2, 16], strides = [1, 1]} : vector<2x128xf32> to vector<2x16xf32>
    %120 = arith.mulf %115, %93 : vector<2x16xf32>
    %121 = arith.mulf %113, %117 : vector<2x16xf32>
    %122 = arith.addf %120, %121 : vector<2x16xf32>
    %123 = math.tanh %122 : vector<2x16xf32>
    %124 = arith.mulf %119, %123 : vector<2x16xf32>
    %c4 = arith.constant 4 : index
    %c0_40 = arith.constant 0 : index
    %c0_41 = arith.constant 0 : index
    %125 = vector.load %arg0[%c4, %c0_40, %c0_41] : memref<8x2x1xf32, #tpu.memory_space<vmem>>, vector<1x2x1xf32>
    %126 = vector.shape_cast %125 : vector<1x2x1xf32> to vector<2x1xf32>
    %127 = vector.broadcast %126 : vector<2x1xf32> to vector<2x128xf32>
    %128 = vector.broadcast %1 : vector<1x128xf32> to vector<2x128xf32>
    %129 = arith.mulf %127, %128 : vector<2x128xf32>
    %130 = vector.broadcast %2 : vector<1x128xf32> to vector<2x128xf32>
    %131 = arith.addf %129, %130 : vector<2x128xf32>
    %cst_42 = arith.constant dense<0.000000e+00> : vector<2x128xf32>
    %132 = tpu.matmul %124, %0, %cst_42 {dimension_numbers = #tpu.dot_dimension_numbers<[1], [0], [0], [1], [0, 0, 1, 1], [], []>} : vector<2x16xf32>, vector<16x128xf32>, vector<2x128xf32> -> vector<2x128xf32>
    %133 = arith.addf %131, %132 : vector<2x128xf32>
    %cst_43 = arith.constant 5.000000e-01 : f32
    %134 = vector.broadcast %cst_43 : f32 to vector<2x128xf32>
    %135 = arith.mulf %134, %133 : vector<2x128xf32>
    %136 = math.tanh %135 : vector<2x128xf32>
    %cst_44 = arith.constant 5.000000e-01 : f32
    %137 = vector.broadcast %cst_44 : f32 to vector<2x128xf32>
    %138 = arith.mulf %137, %136 : vector<2x128xf32>
    %cst_45 = arith.constant 5.000000e-01 : f32
    %139 = vector.broadcast %cst_45 : f32 to vector<2x128xf32>
    %140 = arith.addf %138, %139 : vector<2x128xf32>
    %141 = math.tanh %133 : vector<2x128xf32>
    %142 = vector.extract_strided_slice %140 {offsets = [0, 0], sizes = [2, 16], strides = [1, 1]} : vector<2x128xf32> to vector<2x16xf32>
    %c112_i32_46 = arith.constant 112 : i32
    %143 = tpu.dynamic_rotate %140 by %c112_i32_46 dim 1 : vector<2x128xf32>, i32 -> vector<2x128xf32>
    %144 = vector.extract_strided_slice %143 {offsets = [0, 0], sizes = [2, 16], strides = [1, 1]} : vector<2x128xf32> to vector<2x16xf32>
    %c96_i32_47 = arith.constant 96 : i32
    %145 = tpu.dynamic_rotate %141 by %c96_i32_47 dim 1 : vector<2x128xf32>, i32 -> vector<2x128xf32>
    %146 = vector.extract_strided_slice %145 {offsets = [0, 0], sizes = [2, 16], strides = [1, 1]} : vector<2x128xf32> to vector<2x16xf32>
    %c80_i32_48 = arith.constant 80 : i32
    %147 = tpu.dynamic_rotate %140 by %c80_i32_48 dim 1 : vector<2x128xf32>, i32 -> vector<2x128xf32>
    %148 = vector.extract_strided_slice %147 {offsets = [0, 0], sizes = [2, 16], strides = [1, 1]} : vector<2x128xf32> to vector<2x16xf32>
    %149 = arith.mulf %144, %122 : vector<2x16xf32>
    %150 = arith.mulf %142, %146 : vector<2x16xf32>
    %151 = arith.addf %149, %150 : vector<2x16xf32>
    %152 = math.tanh %151 : vector<2x16xf32>
    %153 = arith.mulf %148, %152 : vector<2x16xf32>
    %c5 = arith.constant 5 : index
    %c0_49 = arith.constant 0 : index
    %c0_50 = arith.constant 0 : index
    %154 = vector.load %arg0[%c5, %c0_49, %c0_50] : memref<8x2x1xf32, #tpu.memory_space<vmem>>, vector<1x2x1xf32>
    %155 = vector.shape_cast %154 : vector<1x2x1xf32> to vector<2x1xf32>
    %156 = vector.broadcast %155 : vector<2x1xf32> to vector<2x128xf32>
    %157 = vector.broadcast %1 : vector<1x128xf32> to vector<2x128xf32>
    %158 = arith.mulf %156, %157 : vector<2x128xf32>
    %159 = vector.broadcast %2 : vector<1x128xf32> to vector<2x128xf32>
    %160 = arith.addf %158, %159 : vector<2x128xf32>
    %cst_51 = arith.constant dense<0.000000e+00> : vector<2x128xf32>
    %161 = tpu.matmul %153, %0, %cst_51 {dimension_numbers = #tpu.dot_dimension_numbers<[1], [0], [0], [1], [0, 0, 1, 1], [], []>} : vector<2x16xf32>, vector<16x128xf32>, vector<2x128xf32> -> vector<2x128xf32>
    %162 = arith.addf %160, %161 : vector<2x128xf32>
    %cst_52 = arith.constant 5.000000e-01 : f32
    %163 = vector.broadcast %cst_52 : f32 to vector<2x128xf32>
    %164 = arith.mulf %163, %162 : vector<2x128xf32>
    %165 = math.tanh %164 : vector<2x128xf32>
    %cst_53 = arith.constant 5.000000e-01 : f32
    %166 = vector.broadcast %cst_53 : f32 to vector<2x128xf32>
    %167 = arith.mulf %166, %165 : vector<2x128xf32>
    %cst_54 = arith.constant 5.000000e-01 : f32
    %168 = vector.broadcast %cst_54 : f32 to vector<2x128xf32>
    %169 = arith.addf %167, %168 : vector<2x128xf32>
    %170 = math.tanh %162 : vector<2x128xf32>
    %171 = vector.extract_strided_slice %169 {offsets = [0, 0], sizes = [2, 16], strides = [1, 1]} : vector<2x128xf32> to vector<2x16xf32>
    %c112_i32_55 = arith.constant 112 : i32
    %172 = tpu.dynamic_rotate %169 by %c112_i32_55 dim 1 : vector<2x128xf32>, i32 -> vector<2x128xf32>
    %173 = vector.extract_strided_slice %172 {offsets = [0, 0], sizes = [2, 16], strides = [1, 1]} : vector<2x128xf32> to vector<2x16xf32>
    %c96_i32_56 = arith.constant 96 : i32
    %174 = tpu.dynamic_rotate %170 by %c96_i32_56 dim 1 : vector<2x128xf32>, i32 -> vector<2x128xf32>
    %175 = vector.extract_strided_slice %174 {offsets = [0, 0], sizes = [2, 16], strides = [1, 1]} : vector<2x128xf32> to vector<2x16xf32>
    %c80_i32_57 = arith.constant 80 : i32
    %176 = tpu.dynamic_rotate %169 by %c80_i32_57 dim 1 : vector<2x128xf32>, i32 -> vector<2x128xf32>
    %177 = vector.extract_strided_slice %176 {offsets = [0, 0], sizes = [2, 16], strides = [1, 1]} : vector<2x128xf32> to vector<2x16xf32>
    %178 = arith.mulf %173, %151 : vector<2x16xf32>
    %179 = arith.mulf %171, %175 : vector<2x16xf32>
    %180 = arith.addf %178, %179 : vector<2x16xf32>
    %181 = math.tanh %180 : vector<2x16xf32>
    %182 = arith.mulf %177, %181 : vector<2x16xf32>
    %c6 = arith.constant 6 : index
    %c0_58 = arith.constant 0 : index
    %c0_59 = arith.constant 0 : index
    %183 = vector.load %arg0[%c6, %c0_58, %c0_59] : memref<8x2x1xf32, #tpu.memory_space<vmem>>, vector<1x2x1xf32>
    %184 = vector.shape_cast %183 : vector<1x2x1xf32> to vector<2x1xf32>
    %185 = vector.broadcast %184 : vector<2x1xf32> to vector<2x128xf32>
    %186 = vector.broadcast %1 : vector<1x128xf32> to vector<2x128xf32>
    %187 = arith.mulf %185, %186 : vector<2x128xf32>
    %188 = vector.broadcast %2 : vector<1x128xf32> to vector<2x128xf32>
    %189 = arith.addf %187, %188 : vector<2x128xf32>
    %cst_60 = arith.constant dense<0.000000e+00> : vector<2x128xf32>
    %190 = tpu.matmul %182, %0, %cst_60 {dimension_numbers = #tpu.dot_dimension_numbers<[1], [0], [0], [1], [0, 0, 1, 1], [], []>} : vector<2x16xf32>, vector<16x128xf32>, vector<2x128xf32> -> vector<2x128xf32>
    %191 = arith.addf %189, %190 : vector<2x128xf32>
    %cst_61 = arith.constant 5.000000e-01 : f32
    %192 = vector.broadcast %cst_61 : f32 to vector<2x128xf32>
    %193 = arith.mulf %192, %191 : vector<2x128xf32>
    %194 = math.tanh %193 : vector<2x128xf32>
    %cst_62 = arith.constant 5.000000e-01 : f32
    %195 = vector.broadcast %cst_62 : f32 to vector<2x128xf32>
    %196 = arith.mulf %195, %194 : vector<2x128xf32>
    %cst_63 = arith.constant 5.000000e-01 : f32
    %197 = vector.broadcast %cst_63 : f32 to vector<2x128xf32>
    %198 = arith.addf %196, %197 : vector<2x128xf32>
    %199 = math.tanh %191 : vector<2x128xf32>
    %200 = vector.extract_strided_slice %198 {offsets = [0, 0], sizes = [2, 16], strides = [1, 1]} : vector<2x128xf32> to vector<2x16xf32>
    %c112_i32_64 = arith.constant 112 : i32
    %201 = tpu.dynamic_rotate %198 by %c112_i32_64 dim 1 : vector<2x128xf32>, i32 -> vector<2x128xf32>
    %202 = vector.extract_strided_slice %201 {offsets = [0, 0], sizes = [2, 16], strides = [1, 1]} : vector<2x128xf32> to vector<2x16xf32>
    %c96_i32_65 = arith.constant 96 : i32
    %203 = tpu.dynamic_rotate %199 by %c96_i32_65 dim 1 : vector<2x128xf32>, i32 -> vector<2x128xf32>
    %204 = vector.extract_strided_slice %203 {offsets = [0, 0], sizes = [2, 16], strides = [1, 1]} : vector<2x128xf32> to vector<2x16xf32>
    %c80_i32_66 = arith.constant 80 : i32
    %205 = tpu.dynamic_rotate %198 by %c80_i32_66 dim 1 : vector<2x128xf32>, i32 -> vector<2x128xf32>
    %206 = vector.extract_strided_slice %205 {offsets = [0, 0], sizes = [2, 16], strides = [1, 1]} : vector<2x128xf32> to vector<2x16xf32>
    %207 = arith.mulf %202, %180 : vector<2x16xf32>
    %208 = arith.mulf %200, %204 : vector<2x16xf32>
    %209 = arith.addf %207, %208 : vector<2x16xf32>
    %210 = math.tanh %209 : vector<2x16xf32>
    %211 = arith.mulf %206, %210 : vector<2x16xf32>
    %c7 = arith.constant 7 : index
    %c0_67 = arith.constant 0 : index
    %c0_68 = arith.constant 0 : index
    %212 = vector.load %arg0[%c7, %c0_67, %c0_68] : memref<8x2x1xf32, #tpu.memory_space<vmem>>, vector<1x2x1xf32>
    %213 = vector.shape_cast %212 : vector<1x2x1xf32> to vector<2x1xf32>
    %214 = vector.broadcast %213 : vector<2x1xf32> to vector<2x128xf32>
    %215 = vector.broadcast %1 : vector<1x128xf32> to vector<2x128xf32>
    %216 = arith.mulf %214, %215 : vector<2x128xf32>
    %217 = vector.broadcast %2 : vector<1x128xf32> to vector<2x128xf32>
    %218 = arith.addf %216, %217 : vector<2x128xf32>
    %cst_69 = arith.constant dense<0.000000e+00> : vector<2x128xf32>
    %219 = tpu.matmul %211, %0, %cst_69 {dimension_numbers = #tpu.dot_dimension_numbers<[1], [0], [0], [1], [0, 0, 1, 1], [], []>} : vector<2x16xf32>, vector<16x128xf32>, vector<2x128xf32> -> vector<2x128xf32>
    %220 = arith.addf %218, %219 : vector<2x128xf32>
    %cst_70 = arith.constant 5.000000e-01 : f32
    %221 = vector.broadcast %cst_70 : f32 to vector<2x128xf32>
    %222 = arith.mulf %221, %220 : vector<2x128xf32>
    %223 = math.tanh %222 : vector<2x128xf32>
    %cst_71 = arith.constant 5.000000e-01 : f32
    %224 = vector.broadcast %cst_71 : f32 to vector<2x128xf32>
    %225 = arith.mulf %224, %223 : vector<2x128xf32>
    %cst_72 = arith.constant 5.000000e-01 : f32
    %226 = vector.broadcast %cst_72 : f32 to vector<2x128xf32>
    %227 = arith.addf %225, %226 : vector<2x128xf32>
    %228 = math.tanh %220 : vector<2x128xf32>
    %229 = vector.extract_strided_slice %227 {offsets = [0, 0], sizes = [2, 16], strides = [1, 1]} : vector<2x128xf32> to vector<2x16xf32>
    %c112_i32_73 = arith.constant 112 : i32
    %230 = tpu.dynamic_rotate %227 by %c112_i32_73 dim 1 : vector<2x128xf32>, i32 -> vector<2x128xf32>
    %231 = vector.extract_strided_slice %230 {offsets = [0, 0], sizes = [2, 16], strides = [1, 1]} : vector<2x128xf32> to vector<2x16xf32>
    %c96_i32_74 = arith.constant 96 : i32
    %232 = tpu.dynamic_rotate %228 by %c96_i32_74 dim 1 : vector<2x128xf32>, i32 -> vector<2x128xf32>
    %233 = vector.extract_strided_slice %232 {offsets = [0, 0], sizes = [2, 16], strides = [1, 1]} : vector<2x128xf32> to vector<2x16xf32>
    %c80_i32_75 = arith.constant 80 : i32
    %234 = tpu.dynamic_rotate %227 by %c80_i32_75 dim 1 : vector<2x128xf32>, i32 -> vector<2x128xf32>
    %235 = vector.extract_strided_slice %234 {offsets = [0, 0], sizes = [2, 16], strides = [1, 1]} : vector<2x128xf32> to vector<2x16xf32>
    %236 = arith.mulf %231, %209 : vector<2x16xf32>
    %237 = arith.mulf %229, %233 : vector<2x16xf32>
    %238 = arith.addf %236, %237 : vector<2x16xf32>
    %239 = math.tanh %238 : vector<2x16xf32>
    %240 = arith.mulf %235, %239 : vector<2x16xf32>
    %241 = vector.broadcast %4 : vector<1x16xf32> to vector<2x16xf32>
    %242 = arith.mulf %240, %241 : vector<2x16xf32>
    %cst_76 = arith.constant dense<0.000000e+00> : vector<2xf32>
    %243 = vector.multi_reduction <add>, %242, %cst_76 [1] : vector<2x16xf32> to vector<2xf32>
    %244 = vector.shape_cast %243 : vector<2xf32> to vector<2x1xf32>
    %245 = vector.broadcast %6 : vector<1x1xf32> to vector<2x1xf32>
    %246 = arith.addf %244, %245 : vector<2x1xf32>
    %c0_77 = arith.constant 0 : index
    %c0_78 = arith.constant 0 : index
    %247 = vector.load %arg2[%c0_77, %c0_78] : memref<2x1xf32, #tpu.memory_space<vmem>>, vector<2x1xf32>
    tpu.vector_store %arg2[%c0_77, %c0_78], %246 {strides = array<i32>} : memref<2x1xf32, #tpu.memory_space<vmem>>, vector<2x1xf32>,
    return
  }
}

</mosaic_0001>

<bundles_post_ra>
// kernel: tpu_custom_call.1
= control target key start
LH: loop header
LB: loop body
LE: loop exit
PB: predicated region body
PF: predicated region fallthrough
CT: control target
= control target key end

     0   :  { %7 = vsyncpa [#allocation3], 0  ;;  %s1030_s9 = smov [#allocation2]   ;;  %s1188_s0 = inlined_call_operand.vmem [shape: f32[8,2,1], index: 0, kind: input, shape index: {}]   ;;  %s1189_s1 = inlined_call_operand.hbm [shape: f32[24,128], index: 1, kind: input, shape index: {}]   ;;  %s1190_s2 = inlined_call_operand.vmem [shape: f32[2,1], index: 2, kind: output, shape index: {}]  }
   0x1   :  { %s15_s10 = sshll.u32 %s1030_s9, 4  ;;  %s16_s10 = int_to_ptr.vmem [resolvable:$true] %s15_s10 }
   0x2   :  { %s1016_s11 = scalar_lea.vmem %s16_s10, 384  ;;  %p1021_p1 = scmp.lt.s32.totalorder %s16_s10, %s16_s10 }
   0x3   :  { %p1017_p0 = scmp.ne.s32.totalorder %s16_s10, %s1016_s11  ;;  %p1022_p2 = scmp.lt.s32.totalorder %s1016_s11, %s1016_s11 }
   0x5   :  { %p1023_p3 = por %p1022_p2, %p1021_p1 }
   0x7   :  { %p1024_p4 = pnand %p1023_p3, %p1017_p0 }
   0x9   :  { %1027 = shalt.err (!%p1024_p4)
}
   0xa   :  { %s1031_s12 = smov 128   ;;  %s1032_s13 = smov 8  }
   0xb   :  { %21 = dma.hbm_to_vmem [thread:$0]  %s1189_s1, 384, %s16_s10, [#allocation3], %s1031_s12, %s1031_s12, %s1032_s13  }
   0xc   :  { %1028 = dma.done.wait [#allocation3], 384  }
   0xd   :  { %1029 = vsyncadd [#allocation3], 4294966912  ;;  %v1033_v0 = vmov 0.0   ;;  %vm1034_vm0 = vmmov 0   ;;  %v1035_v1 = vmov 0   ;;  %v1063_v2 = vld [vmem:[#allocation2 + $0x8] sm:$0xff] }
   0xe   :  { %894 = vmatprep.subr.mxu0 %v1033_v0  ;;  %898 = vmatprep.mubr.msk.f32.mxu0 %vm1034_vm0, %v1033_v0  ;;  %v1065_v3 = vld [vmem:[#allocation2] sm:$0xff]  ;;  %v1085_v6 = vld [vmem:[#allocation2 + $0x10] ss:$0 sm:$0xff]  ;;  %v1088_v8 = vld [vmem:[#allocation2 + $0x11] ss:$0 sm:$0xff]  ;;  %s1036_s17 = smov 96  }
   0xf   :  { %959 = vset.pattern.permute.xlu0 %v1035_v1  ;;  %901 = vmatprep.subr.mxu1 %v1033_v0  ;;  %v31_v4 = vld [vmem:[%s1188_s0] sm:$0x3]  ;;  %s1037_s18 = smov 80   ;;  %s1038_s19 = smov 112   ;;  %v854_v18 = vld [vmem:[%s1188_s0 + $0x2] sm:$0x3] }
  0x10   :  { %905 = vmatprep.mubr.msk.f32.mxu1 %vm1034_vm0, %v1033_v0  ;;  %895 = vmatpush3.msra.mxu0 %v1063_v2  ;;  %vm47_vm1 = vcmask 130048   ;;  %v856_v36 = vld [vmem:[%s1188_s0 + $0x4] sm:$0x3]  ;;  %v858_v56 = vld [vmem:[%s1188_s0 + $0x6] sm:$0x3]  ;;  %vm836_vm2 = vcmask 123904  }
  0x11   :  { %34 = vperm.xlu0 %959, %v31_v4   ;;  %896 = vmatprep.subr.mxu0 %v1033_v0  ;;  %vm845_vm3 = vcmask 1024  }
  0x12   :  { %902 = vmatpush3.msra.mxu1 %v1063_v2  ;;  %897 = vmatpush3.msra.mxu0 %v1065_v3 }
  0x13   :  { %903 = vmatprep.subr.mxu1 %v1033_v0  ;;  %899 = vmatmul.mubr.f32.vlgmr.msra.gmra.mxu0 %v1033_v0 }
  0x14   :  { %904 = vmatpush3.msra.mxu1 %v1065_v3  ;;  %908 = vmatprep.subr.mxu0 %v1033_v0 }
  0x15   :  { %912 = vmatprep.mubr.msk.f32.mxu0 %vm1034_vm0, %v1033_v0  ;;  %909 = vmatpush3.msra.mxu0 %v1063_v2 }
  0x16   :  { %915 = vmatprep.subr.mxu1 %v1033_v0  ;;  %910 = vmatprep.subr.mxu0 %v1033_v0 }
  0x17   :  { %911 = vmatpush3.msra.mxu0 %v1065_v3 }
  0x18   :  { %922 = vmatprep.subr.mxu0 %v1033_v0 }
  0x8c   :  { %v35_v5 = vpop.permute.xlu0 %34 }
  0x8d   :  { %v41_v7 = vmul.f32 %v1085_v6, %v35_v5 }
  0x8f   :  { %v46_v9 = vadd.f32 %v1088_v8, %v41_v7 }
  0xd3   :  { %v117_v10 = vpop.f32.mrf.mxu0 }
  0xd4   :  { %v121_v11 = vadd.f32 %v117_v10, %v46_v9 }
  0xd5   :  { %v900_v12 = vpop.f32.mrf.mxu0 }
  0xd6   :  { %v122_v13 = vmul.f32 0.5, %v121_v11  ;;  %960 = vtanh.f32 %v121_v11 }
  0xd8   :  { %962 = vtanh.f32 %v122_v13 }
  0xe3   :  { %v961_v14 = vpop.eup %960 }
  0xe4   :  { %129 = vrot.lane.b32.xlu1 %v961_v14, %s1036_s17 }
  0xe5   :  { %v963_v15 = vpop.eup %962 }
  0xe6   :  { %v124_v16 = vmul.f32 0.5, %v963_v15 }
  0xe8   :  { %v125_v17 = vadd.f32 0.5, %v124_v16 }
  0xea   :  { %131 = vrot.lane.b32.xlu1 %v125_v17, %s1037_s18  ;;  %127 = vrot.lane.b32.xlu0 %v125_v17, %s1038_s19 }
  0xee   :  { %142 = vperm.xlu0 %959, %v854_v18  }
 0x156   :  { %v130_v19 = vpop.permute.xlu1 %129 }
 0x157   :  { %v134_v21 = vmul.f32 %v130_v19, %v125_v17  ;;  %v860_v17 = vld [vmem:[%s1188_s0 + $0x8] sm:$0x3] }
 0x15c   :  { %v128_v20 = vpop.permute.xlu0 %127  ;;  %v132_v25 = vpop.permute.xlu1 %131 }
 0x15d   :  { %v133_v22 = vmul.f32 0.0, %v128_v20 }
 0x15f   :  { %v135_v23 = vadd.f32 %v134_v21, %v133_v22 }
 0x161   :  { %964 = vtanh.f32 %v135_v23 }
 0x169   :  { %v143_v27 = vpop.permute.xlu0 %142 }
 0x16a   :  { %v145_v28 = vmul.f32 %v1085_v6, %v143_v27 }
 0x16c   :  { %v146_v29 = vadd.f32 %v1088_v8, %v145_v28 }
 0x16e   :  { %v965_v24 = vpop.eup %964 }
 0x16f   :  { %v137_v26 = vmul.f32 %v965_v24, %v132_v25 }
 0x171   :  { %906 = vmatmul.mubr.msk.f32.vlgmr.msra.gmra.mxu1 %vm47_vm1, %v137_v26 }
 0x172   :  { %916 = vmatpush3.msra.mxu1 %v1063_v2  ;;  %919 = vmatprep.mubr.msk.f32.mxu1 %vm1034_vm0, %v1033_v0 }
 0x173   :  { %917 = vmatprep.subr.mxu1 %v1033_v0 }
 0x174   :  { %918 = vmatpush3.msra.mxu1 %v1065_v3 }
 0x175   :  { %929 = vmatprep.subr.mxu1 %v1033_v0 }
 0x231   :  { %v216_v30 = vpop.f32.mrf.mxu1 }
 0x232   :  { %v220_v31 = vadd.f32 %v216_v30, %v146_v29 }
 0x233   :  { %v907_v32 = vpop.f32.mrf.mxu1 }
 0x234   :  { %v221_v33 = vmul.f32 0.5, %v220_v31  ;;  %966 = vtanh.f32 %v220_v31 }
 0x236   :  { %968 = vtanh.f32 %v221_v33 }
 0x241   :  { %v967_v34 = vpop.eup %966 }
 0x242   :  { %228 = vrot.lane.b32.xlu0 %v967_v34, %s1036_s17 }
 0x243   :  { %v969_v35 = vpop.eup %968 }
 0x244   :  { %v223_v37 = vmul.f32 0.5, %v969_v35 }
 0x246   :  { %241 = vperm.xlu0 %959, %v856_v36   ;;  %v224_v38 = vadd.f32 0.5, %v223_v37  ;;  %v862_v37 = vld [vmem:[%s1188_s0 + $0xa] sm:$0x3] }
 0x248   :  { %226 = vrot.lane.b32.xlu1 %v224_v38, %s1038_s19 }
 0x24c   :  { %230 = vrot.lane.b32.xlu1 %v224_v38, %s1037_s18 }
 0x2b4   :  { %v229_v39 = vpop.permute.xlu0 %228 }
 0x2b5   :  { %v233_v41 = vmul.f32 %v229_v39, %v224_v38 }
 0x2ba   :  { %v227_v40 = vpop.permute.xlu1 %226 }
 0x2bb   :  { %v232_v42 = vmul.f32 %v227_v40, %v135_v23 }
 0x2bd   :  { %v234_v43 = vadd.f32 %v233_v41, %v232_v42 }
 0x2be   :  { %v231_v45 = vpop.permute.xlu1 %230 }
 0x2bf   :  { %970 = vtanh.f32 %v234_v43 }
 0x2c1   :  { %v242_v47 = vpop.permute.xlu0 %241 }
 0x2c2   :  { %v244_v48 = vmul.f32 %v1085_v6, %v242_v47 }
 0x2c4   :  { %v245_v49 = vadd.f32 %v1088_v8, %v244_v48 }
 0x2cc   :  { %v971_v44 = vpop.eup %970 }
 0x2cd   :  { %v236_v46 = vmul.f32 %v971_v44, %v231_v45 }
 0x2cf   :  { %913 = vmatmul.mubr.msk.f32.vlgmr.msra.gmra.mxu0 %vm47_vm1, %v236_v46 }
 0x2d0   :  { %923 = vmatpush3.msra.mxu0 %v1063_v2  ;;  %926 = vmatprep.mubr.msk.f32.mxu0 %vm1034_vm0, %v1033_v0 }
 0x2d1   :  { %924 = vmatprep.subr.mxu0 %v1033_v0 }
 0x2d2   :  { %925 = vmatpush3.msra.mxu0 %v1065_v3 }
 0x2d3   :  { %936 = vmatprep.subr.mxu0 %v1033_v0 }
 0x38f   :  { %v315_v50 = vpop.f32.mrf.mxu0 }
 0x390   :  { %v319_v51 = vadd.f32 %v315_v50, %v245_v49 }
 0x391   :  { %v914_v52 = vpop.f32.mrf.mxu0 }
 0x392   :  { %v320_v53 = vmul.f32 0.5, %v319_v51  ;;  %972 = vtanh.f32 %v319_v51 }
 0x394   :  { %974 = vtanh.f32 %v320_v53 }
 0x39f   :  { %v973_v54 = vpop.eup %972 }
 0x3a0   :  { %327 = vrot.lane.b32.xlu0 %v973_v54, %s1036_s17 }
 0x3a1   :  { %v975_v55 = vpop.eup %974 }
 0x3a2   :  { %v322_v57 = vmul.f32 0.5, %v975_v55 }
 0x3a4   :  { %340 = vperm.xlu0 %959, %v858_v56   ;;  %v323_v58 = vadd.f32 0.5, %v322_v57 }
 0x3a6   :  { %325 = vrot.lane.b32.xlu1 %v323_v58, %s1038_s19 }
 0x3aa   :  { %329 = vrot.lane.b32.xlu1 %v323_v58, %s1037_s18 }
 0x412   :  { %v328_v59 = vpop.permute.xlu0 %327 }
 0x413   :  { %v332_v61 = vmul.f32 %v328_v59, %v323_v58 }
 0x418   :  { %v326_v60 = vpop.permute.xlu1 %325 }
 0x419   :  { %v331_v62 = vmul.f32 %v326_v60, %v234_v43 }
 0x41b   :  { %v333_v63 = vadd.f32 %v332_v61, %v331_v62 }
 0x41c   :  { %v330_v4 = vpop.permute.xlu1 %329 }
 0x41d   :  { %976 = vtanh.f32 %v333_v63 }
 0x41f   :  { %v341_v7 = vpop.permute.xlu0 %340 }
 0x420   :  { %v343_v9 = vmul.f32 %v1085_v6, %v341_v7 }
 0x422   :  { %v344_v10 = vadd.f32 %v1088_v8, %v343_v9 }
 0x42a   :  { %v977_v1 = vpop.eup %976 }
 0x42b   :  { %v335_v5 = vmul.f32 %v977_v1, %v330_v4 }
 0x42d   :  { %920 = vmatmul.mubr.msk.f32.vlgmr.msra.gmra.mxu1 %vm47_vm1, %v335_v5 }
 0x42e   :  { %930 = vmatpush3.msra.mxu1 %v1063_v2  ;;  %933 = vmatprep.mubr.msk.f32.mxu1 %vm1034_vm0, %v1033_v0 }
 0x42f   :  { %931 = vmatprep.subr.mxu1 %v1033_v0 }
 0x430   :  { %932 = vmatpush3.msra.mxu1 %v1065_v3 }
 0x431   :  { %943 = vmatprep.subr.mxu1 %v1033_v0 }
 0x4ed   :  { %v414_v11 = vpop.f32.mrf.mxu1 }
 0x4ee   :  { %v418_v12 = vadd.f32 %v414_v11, %v344_v10 }
 0x4ef   :  { %v921_v13 = vpop.f32.mrf.mxu1 }
 0x4f0   :  { %v419_v14 = vmul.f32 0.5, %v418_v12  ;;  %978 = vtanh.f32 %v418_v12 }
 0x4f2   :  { %980 = vtanh.f32 %v419_v14 }
 0x4fd   :  { %v979_v15 = vpop.eup %978 }
 0x4fe   :  { %426 = vrot.lane.b32.xlu0 %v979_v15, %s1036_s17  ;;  %v866_v15 = vld [vmem:[%s1188_s0 + $0xe] sm:$0x3] }
 0x4ff   :  { %v981_v16 = vpop.eup %980 }
 0x500   :  { %v421_v18 = vmul.f32 0.5, %v981_v16 }
 0x502   :  { %439 = vperm.xlu0 %959, %v860_v17   ;;  %v422_v19 = vadd.f32 0.5, %v421_v18 }
 0x504   :  { %424 = vrot.lane.b32.xlu1 %v422_v19, %s1038_s19 }
 0x508   :  { %428 = vrot.lane.b32.xlu1 %v422_v19, %s1037_s18 }
 0x570   :  { %v427_v20 = vpop.permute.xlu0 %426 }
 0x571   :  { %v431_v22 = vmul.f32 %v427_v20, %v422_v19 }
 0x576   :  { %v425_v21 = vpop.permute.xlu1 %424 }
 0x577   :  { %v430_v23 = vmul.f32 %v425_v21, %v333_v63 }
 0x579   :  { %v432_v24 = vadd.f32 %v431_v22, %v430_v23 }
 0x57a   :  { %v429_v26 = vpop.permute.xlu1 %428 }
 0x57b   :  { %982 = vtanh.f32 %v432_v24 }
 0x57d   :  { %v440_v28 = vpop.permute.xlu0 %439 }
 0x57e   :  { %v442_v29 = vmul.f32 %v1085_v6, %v440_v28 }
 0x580   :  { %v443_v30 = vadd.f32 %v1088_v8, %v442_v29 }
 0x588   :  { %v983_v25 = vpop.eup %982 }
 0x589   :  { %v434_v27 = vmul.f32 %v983_v25, %v429_v26 }
 0x58b   :  { %927 = vmatmul.mubr.msk.f32.vlgmr.msra.gmra.mxu0 %vm47_vm1, %v434_v27 }
 0x58c   :  { %937 = vmatpush3.msra.mxu0 %v1063_v2  ;;  %940 = vmatprep.mubr.msk.f32.mxu0 %vm1034_vm0, %v1033_v0 }
 0x58d   :  { %938 = vmatprep.subr.mxu0 %v1033_v0 }
 0x58e   :  { %939 = vmatpush3.msra.mxu0 %v1065_v3 }
 0x64b   :  { %v513_v31 = vpop.f32.mrf.mxu0 }
 0x64c   :  { %v517_v32 = vadd.f32 %v513_v31, %v443_v30 }
 0x64d   :  { %v928_v33 = vpop.f32.mrf.mxu0 }
 0x64e   :  { %v518_v34 = vmul.f32 0.5, %v517_v32  ;;  %984 = vtanh.f32 %v517_v32 }
 0x650   :  { %986 = vtanh.f32 %v518_v34 }
 0x65b   :  { %v985_v35 = vpop.eup %984 }
 0x65c   :  { %525 = vrot.lane.b32.xlu0 %v985_v35, %s1036_s17 }
 0x65d   :  { %v987_v36 = vpop.eup %986 }
 0x65e   :  { %v520_v38 = vmul.f32 0.5, %v987_v36 }
 0x660   :  { %538 = vperm.xlu0 %959, %v862_v37   ;;  %v521_v39 = vadd.f32 0.5, %v520_v38 }
 0x662   :  { %523 = vrot.lane.b32.xlu1 %v521_v39, %s1038_s19 }
 0x666   :  { %527 = vrot.lane.b32.xlu1 %v521_v39, %s1037_s18 }
 0x6ce   :  { %v526_v40 = vpop.permute.xlu0 %525 }
 0x6cf   :  { %v530_v42 = vmul.f32 %v526_v40, %v521_v39 }
 0x6d4   :  { %v524_v41 = vpop.permute.xlu1 %523 }
 0x6d5   :  { %v529_v43 = vmul.f32 %v524_v41, %v432_v24 }
 0x6d7   :  { %v531_v44 = vadd.f32 %v530_v42, %v529_v43  ;;  %v868_v42 = vld [vmem:[#allocation2 + $0x12] ss:$0 sm:$0xff] }
 0x6d8   :  { %v528_v46 = vpop.permute.xlu1 %527 }
 0x6d9   :  { %988 = vtanh.f32 %v531_v44 }
 0x6db   :  { %v539_v48 = vpop.permute.xlu0 %538 }
 0x6dc   :  { %v541_v49 = vmul.f32 %v1085_v6, %v539_v48 }
 0x6de   :  { %v542_v50 = vadd.f32 %v1088_v8, %v541_v49 }
 0x6e6   :  { %v989_v45 = vpop.eup %988 }
 0x6e7   :  { %v533_v47 = vmul.f32 %v989_v45, %v528_v46  ;;  %v869_v46 = vld [vmem:[#allocation2 + $0x13] ss:$0 sm:$0xff] }
 0x6e9   :  { %934 = vmatmul.mubr.msk.f32.vlgmr.msra.gmra.mxu1 %vm47_vm1, %v533_v47 }
 0x6ea   :  { %944 = vmatpush3.msra.mxu1 %v1063_v2  ;;  %947 = vmatprep.mubr.msk.f32.mxu1 %vm1034_vm0, %v1033_v0 }
 0x6eb   :  { %945 = vmatprep.subr.mxu1 %v1033_v0  ;;  %v864_v0 = vld [vmem:[%s1188_s0 + $0xc] sm:$0x3] }
 0x6ec   :  { %946 = vmatpush3.msra.mxu1 %v1065_v3 }
 0x7a9   :  { %v612_v51 = vpop.f32.mrf.mxu1 }
 0x7aa   :  { %v616_v52 = vadd.f32 %v612_v51, %v542_v50 }
 0x7ab   :  { %v935_v53 = vpop.f32.mrf.mxu1 }
 0x7ac   :  { %v617_v54 = vmul.f32 0.5, %v616_v52  ;;  %990 = vtanh.f32 %v616_v52 }
 0x7ae   :  { %992 = vtanh.f32 %v617_v54 }
 0x7b9   :  { %v991_v55 = vpop.eup %990 }
 0x7ba   :  { %624 = vrot.lane.b32.xlu0 %v991_v55, %s1036_s17 }
 0x7bb   :  { %v993_v2 = vpop.eup %992 }
 0x7bc   :  { %v619_v3 = vmul.f32 0.5, %v993_v2 }
 0x7be   :  { %637 = vperm.xlu0 %959, %v864_v0   ;;  %v620_v56 = vadd.f32 0.5, %v619_v3 }
 0x7c0   :  { %622 = vrot.lane.b32.xlu1 %v620_v56, %s1038_s19 }
 0x7c4   :  { %626 = vrot.lane.b32.xlu1 %v620_v56, %s1037_s18 }
 0x82c   :  { %v625_v57 = vpop.permute.xlu0 %624 }
 0x82d   :  { %v629_v59 = vmul.f32 %v625_v57, %v620_v56 }
 0x832   :  { %v623_v58 = vpop.permute.xlu1 %622 }
 0x833   :  { %v628_v60 = vmul.f32 %v623_v58, %v531_v44 }
 0x835   :  { %v630_v61 = vadd.f32 %v629_v59, %v628_v60 }
 0x836   :  { %v627_v63 = vpop.permute.xlu1 %626 }
 0x837   :  { %994 = vtanh.f32 %v630_v61 }
 0x839   :  { %v638_v4 = vpop.permute.xlu0 %637 }
 0x83a   :  { %v640_v5 = vmul.f32 %v1085_v6, %v638_v4 }
 0x83c   :  { %v641_v7 = vadd.f32 %v1088_v8, %v640_v5 }
 0x844   :  { %v995_v62 = vpop.eup %994 }
 0x845   :  { %v632_v1 = vmul.f32 %v995_v62, %v627_v63 }
 0x847   :  { %941 = vmatmul.mubr.msk.f32.vlgmr.msra.gmra.mxu0 %vm47_vm1, %v632_v1 }
 0x907   :  { %v711_v9 = vpop.f32.mrf.mxu0 }
 0x908   :  { %v715_v10 = vadd.f32 %v711_v9, %v641_v7 }
 0x909   :  { %v942_v11 = vpop.f32.mrf.mxu0 }
 0x90a   :  { %v716_v12 = vmul.f32 0.5, %v715_v10  ;;  %996 = vtanh.f32 %v715_v10 }
 0x90c   :  { %998 = vtanh.f32 %v716_v12 }
 0x917   :  { %v997_v13 = vpop.eup %996 }
 0x918   :  { %723 = vrot.lane.b32.xlu0 %v997_v13, %s1036_s17 }
 0x919   :  { %v999_v14 = vpop.eup %998 }
 0x91a   :  { %v718_v16 = vmul.f32 0.5, %v999_v14 }
 0x91c   :  { %736 = vperm.xlu0 %959, %v866_v15   ;;  %v719_v17 = vadd.f32 0.5, %v718_v16 }
 0x91e   :  { %721 = vrot.lane.b32.xlu1 %v719_v17, %s1038_s19 }
 0x922   :  { %725 = vrot.lane.b32.xlu1 %v719_v17, %s1037_s18 }
 0x98a   :  { %v724_v18 = vpop.permute.xlu0 %723 }
 0x98b   :  { %v728_v20 = vmul.f32 %v724_v18, %v719_v17 }
 0x990   :  { %v722_v19 = vpop.permute.xlu1 %721 }
 0x991   :  { %v727_v21 = vmul.f32 %v722_v19, %v630_v61 }
 0x993   :  { %v729_v22 = vadd.f32 %v728_v20, %v727_v21 }
 0x994   :  { %v726_v24 = vpop.permute.xlu1 %725 }
 0x995   :  { %1000 = vtanh.f32 %v729_v22 }
 0x997   :  { %v737_v26 = vpop.permute.xlu0 %736 }
 0x998   :  { %v739_v27 = vmul.f32 %v1085_v6, %v737_v26 }
 0x99a   :  { %v740_v28 = vadd.f32 %v1088_v8, %v739_v27 }
 0x9a2   :  { %v1001_v23 = vpop.eup %1000 }
 0x9a3   :  { %v731_v25 = vmul.f32 %v1001_v23, %v726_v24 }
 0x9a5   :  { %948 = vmatmul.mubr.msk.f32.vlgmr.msra.gmra.mxu1 %vm47_vm1, %v731_v25 }
 0xa65   :  { %v810_v29 = vpop.f32.mrf.mxu1 }
 0xa66   :  { %v814_v30 = vadd.f32 %v810_v29, %v740_v28 }
 0xa67   :  { %v949_v31 = vpop.f32.mrf.mxu1 }
 0xa68   :  { %v815_v32 = vmul.f32 0.5, %v814_v30  ;;  %1002 = vtanh.f32 %v814_v30 }
 0xa6a   :  { %1004 = vtanh.f32 %v815_v32 }
 0xa75   :  { %v1003_v33 = vpop.eup %1002 }
 0xa76   :  { %822 = vrot.lane.b32.xlu0 %v1003_v33, %s1036_s17 }
 0xa77   :  { %v1005_v34 = vpop.eup %1004 }
 0xa78   :  { %v817_v35 = vmul.f32 0.5, %v1005_v34 }
 0xa7a   :  { %v818_v36 = vadd.f32 0.5, %v817_v35 }
 0xa7c   :  { %820 = vrot.lane.b32.xlu1 %v818_v36, %s1038_s19 }
 0xa80   :  { %824 = vrot.lane.b32.xlu1 %v818_v36, %s1037_s18 }
 0xae8   :  { %v823_v37 = vpop.permute.xlu0 %822 }
 0xae9   :  { %v827_v38 = vmul.f32 %v823_v37, %v818_v36 }
 0xaee   :  { %v821_v6 = vpop.permute.xlu1 %820 }
 0xaef   :  { %v826_v8 = vmul.f32 %v821_v6, %v729_v22 }
 0xaf1   :  { %v828_v39 = vadd.f32 %v827_v38, %v826_v8 }
 0xaf2   :  { %v825_v41 = vpop.permute.xlu1 %824 }
 0xaf3   :  { %1006 = vtanh.f32 %v828_v39 }
 0xb00   :  { %v1007_v40 = vpop.eup %1006 }
 0xb01   :  { %v830_v43 = vmul.f32 %v1007_v40, %v825_v41 }
 0xb03   :  { %v835_v44 = vmul.f32 %v868_v42, %v830_v43 }
 0xb05   :  { %v837_v45 = vsel %vm836_vm2, %v835_v44, 0.0 }
 0xb06   :  { %838 = vadd.xlane.f32.xlu0 %v837_v45 }
 0xb8f   :  { %v839_v47 = vpop.xlane.xlu0 %838 }
 0xb90   :  { %v844_v48 = vadd.f32 %v869_v46, %v839_v47 }
 0xb92   :  { %846 = vst.msk [vmem:[%s1190_s2] sm:$0x3] %vm845_vm3, %v844_v48 }
 0xb93   :  { %851 = vsyncpa [#allocation3], 1 }

</bundles_post_ra>
